<compile_context>
chip_gen: v6e
topology: v6e:2x2x1
jax: 0.10.0
libtpu: 0.0.40
codegen_flags: <defaults>
</compile_context>

<pallas_src>
import functools

import jax
import jax.numpy as jnp
from jax.experimental import pallas as pl
from jax.experimental.pallas import tpu as pltpu

# Layer dims of the Sequential chain: 8 -> 4 -> 16 -> 16 -> 4 -> 8
DIMS = [8, 4, 16, 16, 4, 8]
BATCH = 4           # module's get_input(): torch.rand(4, 8)

PACK = 16           # samples packed per 128-lane vreg row (16 * 8 = 128)
LANES = PACK * DIMS[0]   # 128 (in-dim == out-dim == 8, so packing is symmetric)


def _affine_kernel(x_ref, w_ref, b_ref, o_ref):
    """One fused affine per grid step: o = x_block @ W_blockdiag + b_tiled.

    x_ref: (TILE_ROWS, 128) streamed block of packed samples.
    w_ref: (128, 128) block-diagonal effective weight, pinned in VMEM.
    b_ref: (1, 128) tiled effective bias, pinned in VMEM.
    """
    o_ref[...] = (
        jnp.dot(x_ref[...], w_ref[...], preferred_element_type=jnp.float32)
        + b_ref[...]
    )


def _precompose(params):
    """Fold the 5-layer affine chain into one (W_eff, b_eff) pair.

    No nonlinearities in the module, so this is exact (up to fp reordering).
    Runs inside the same jit as the kernel call, so it fuses / constant-folds.
    """
    w_eff, b_eff = params[0]
    for w, b in params[1:]:
        w_eff = w_eff @ w
        b_eff = b_eff @ w + b
    return w_eff, b_eff


@functools.partial(jax.jit, static_argnames=("tile_rows", "use_pallas"))
def nested_wrapped_forward(x, params, tile_rows=512, use_pallas=True):
    """x: (N, 8) f32.  params: list of (W (in,out), b (1,out)) f32 pairs."""
    w_eff, b_eff = _precompose(params)          # (8, 8), (1, 8)

    if not use_pallas:
        # Tiny-batch fast path: let XLA fuse the dot with the precompose GEMMs.
        return x @ w_eff + b_eff

    n = x.shape[0]

    # ---- pack 16 samples per 128-lane row --------------------------------
    rows = -(-n // PACK)                        # ceil(n / 16)
    n_pad = rows * PACK
    if n_pad != n:
        x = jnp.pad(x, ((0, n_pad - n), (0, 0)))
    x_packed = x.reshape(rows, LANES)

    # Block-diagonal weight: 16 independent copies of w_eff along the diagonal.
    w_block = jnp.kron(jnp.eye(PACK, dtype=w_eff.dtype), w_eff)   # (128, 128)
    b_tiled = jnp.tile(b_eff, (1, PACK))                          # (1, 128)

    # ---- row tiling for the grid ------------------------------------------
    # Clamp the tile to the (sublane-aligned) packed row count for small N.
    tile = max(8, min(tile_rows, ((rows + 7) // 8) * 8))
    rows_pad = -(-rows // tile) * tile
    if rows_pad != rows:
        x_packed = jnp.pad(x_packed, ((0, rows_pad - rows), (0, 0)))
    grid = (rows_pad // tile,)

    y_packed = pl.pallas_call(
        _affine_kernel,
        out_shape=jax.ShapeDtypeStruct((rows_pad, LANES), jnp.float32),
        grid_spec=pltpu.PrefetchScalarGridSpec(
            num_scalar_prefetch=0,
            grid=grid,
            in_specs=[
                # x streams block-by-block (auto double-buffered).
                pl.BlockSpec((tile, LANES), lambda i: (i, 0)),
                # W / b pinned: same block index every step -> DMA'd once.
                pl.BlockSpec((LANES, LANES), lambda i: (0, 0)),
                pl.BlockSpec((1, LANES), lambda i: (0, 0)),
            ],
            out_specs=pl.BlockSpec((tile, LANES), lambda i: (i, 0)),
        ),
        compiler_params=pltpu.CompilerParams(
            # Independent row blocks -> shard across v7x's 2 TensorCores.
            dimension_semantics=("parallel",),
        ),
    )(x_packed, w_block, b_tiled)

    # Unpack: drop row padding, then sample padding.
    return y_packed[:rows].reshape(n_pad, DIMS[-1])[:n]


def init_params(key):
    """Deterministic init mimicking nn.Linear defaults (uniform +-1/sqrt(fan_in))."""
    params = []
    for i in range(len(DIMS) - 1):
        fan_in, fan_out = DIMS[i], DIMS[i + 1]
        key, kw, kb = jax.random.split(key, 3)
        bound = 1.0 / jnp.sqrt(float(fan_in))
        w = jax.random.uniform(kw, (fan_in, fan_out), jnp.float32, -bound, bound)
        b = jax.random.uniform(kb, (1, fan_out), jnp.float32, -bound, bound)
        params.append((w, b))
    return params


def reference_forward(x, params):
    """Layer-by-layer reference (matches the original un-fused module math)."""
    h = x
    for w, b in params:
        h = h @ w + b
    return h


if __name__ == "__main__":
    key = jax.random.PRNGKey(0)
    key, kx_small, kx_big = jax.random.split(key, 3)
    params = init_params(key)

    # 1) Module-native input: get_input() -> torch.rand(4, 8).
    x_small = jax.random.uniform(kx_small, (BATCH, DIMS[0]), jnp.float32)
    out_small = nested_wrapped_forward(x_small, params)
    jax.block_until_ready(out_small)
    ref_small = reference_forward(x_small, params)
    assert out_small.shape == (BATCH, DIMS[-1])
    assert jnp.allclose(out_small, ref_small, atol=2e-5, rtol=1e-5), \
        "small-batch mismatch vs JAX reference"

    # 2) Batched path: exercises packing + multi-step row grid (small tile
    #    here just to cover >1 grid step; production default is tile_rows=512).
    n_big = 4096
    x_big = jax.random.uniform(kx_big, (n_big, DIMS[0]), jnp.float32)
    out_big = nested_wrapped_forward(x_big, params, tile_rows=64)
    jax.block_until_ready(out_big)
    ref_big = reference_forward(x_big, params)
    assert out_big.shape == (n_big, DIMS[-1])
    assert jnp.allclose(out_big, ref_big, atol=2e-5, rtol=1e-5), \
        "batched mismatch vs JAX reference"

    # 3) Tiny-batch fast path (no pallas_call) agrees as well.
    out_fast = nested_wrapped_forward(x_small, params, use_pallas=False)
    jax.block_until_ready(out_fast)
    assert jnp.allclose(out_fast, ref_small, atol=2e-5, rtol=1e-5)

    # TODO(synk): FSDP sharding / process-group mechanics have no forward-math
    # effect and are intentionally not modeled.

    print("KERNEL_OK")
</pallas_src>

<mosaic_0001>
module attributes {stable_mosaic.version = 11 : i64} {
  func.func @_affine_kernel(%arg0: i32, %arg1: memref<8x128xf32, #tpu.memory_space<vmem>>, %arg2: memref<128x128xf32, #tpu.memory_space<vmem>>, %arg3: memref<1x128xf32, #tpu.memory_space<vmem>>, %arg4: memref<8x128xf32, #tpu.memory_space<vmem>>) attributes {dimension_semantics = [#tpu.dimension_semantics<parallel>], iteration_bounds = array<i64: 1>, scalar_prefetch = 0 : i64, scratch_operands = 0 : i64, tpu.core_type = #tpu.core_type<tc>, window_params = [{transform_indices = @transform_0, window_bounds = array<i64: 8, 128>}, {pipeline_mode = #tpu.pipeline_mode<synchronous>, transform_indices = @transform_1, window_bounds = array<i64: 128, 128>}, {pipeline_mode = #tpu.pipeline_mode<synchronous>, transform_indices = @transform_2, window_bounds = array<i64: 1, 128>}, {transform_indices = @transform_3, window_bounds = array<i64: 8, 128>}]} {
    %c0 = arith.constant 0 : index
    %c0_0 = arith.constant 0 : index
    %0 = vector.load %arg1[%c0, %c0_0] : memref<8x128xf32, #tpu.memory_space<vmem>>, vector<8x128xf32>
    %c0_1 = arith.constant 0 : index
    %c0_2 = arith.constant 0 : index
    %1 = vector.load %arg2[%c0_1, %c0_2] : memref<128x128xf32, #tpu.memory_space<vmem>>, vector<128x128xf32>
    %cst = arith.constant dense<0.000000e+00> : vector<8x128xf32>
    %2 = tpu.matmul %0, %1, %cst {dimension_numbers = #tpu.dot_dimension_numbers<[1], [0], [0], [1], [0, 0, 1, 1], [], []>} : vector<8x128xf32>, vector<128x128xf32>, vector<8x128xf32> -> vector<8x128xf32>
    %c0_3 = arith.constant 0 : index
    %c0_4 = arith.constant 0 : index
    %3 = vector.load %arg3[%c0_3, %c0_4] : memref<1x128xf32, #tpu.memory_space<vmem>>, vector<1x128xf32>
    %4 = vector.broadcast %3 : vector<1x128xf32> to vector<8x128xf32>
    %5 = arith.addf %2, %4 : vector<8x128xf32>
    %c0_5 = arith.constant 0 : index
    %c0_6 = arith.constant 0 : index
    %6 = vector.load %arg4[%c0_5, %c0_6] : memref<8x128xf32, #tpu.memory_space<vmem>>, vector<8x128xf32>
    tpu.vector_store %arg4[%c0_5, %c0_6], %5 {strides = array<i32>} : memref<8x128xf32, #tpu.memory_space<vmem>>, vector<8x128xf32>,
    return
  }
  func.func @transform_0(%arg0: i32) -> (i32, i32) {
    %c0_i32 = arith.constant 0 : i32
    %c0_i32_0 = arith.constant 0 : i32
    return %arg0, %c0_i32 : i32, i32
  }
  func.func @transform_1(%arg0: i32) -> (i32, i32) {
    %c0_i32 = arith.constant 0 : i32
    %c0_i32_0 = arith.constant 0 : i32
    %c0_i32_1 = arith.constant 0 : i32
    return %c0_i32, %c0_i32_0 : i32, i32
  }
  func.func @transform_2(%arg0: i32) -> (i32, i32) {
    %c0_i32 = arith.constant 0 : i32
    %c0_i32_0 = arith.constant 0 : i32
    %c0_i32_1 = arith.constant 0 : i32
    return %c0_i32, %c0_i32_0 : i32, i32
  }
  func.func @transform_3(%arg0: i32) -> (i32, i32) {
    %c0_i32 = arith.constant 0 : i32
    %c0_i32_0 = arith.constant 0 : i32
    return %arg0, %c0_i32 : i32, i32
  }
}

</mosaic_0001>

<bundles_post_ra>
// kernel: nested_wrapped_forward.1
= control target key start
LH: loop header
LB: loop body
LE: loop exit
PB: predicated region body
PF: predicated region fallthrough
CT: control target
= control target key end

     0   :  { %v168_v0 = vmov 0.0   ;;  %vm169_vm0 = vmmov 0   ;;  %s247_s1 = inlined_call_operand.vmem [shape: f32[128,128], index: 1, kind: input, shape index: {}]   ;;  %s248_s0 = inlined_call_operand.vmem [shape: f32[8,128], index: 0, kind: input, shape index: {}]   ;;  %s249_s2 = inlined_call_operand.vmem [shape: f32[1,128], index: 2, kind: input, shape index: {}]   ;;  %s250_s3 = inlined_call_operand.vmem [shape: f32[8,128], index: 3, kind: output, shape index: {}]  }
   0x1   :  { %131 = vmatprep.subr.mxu0 %v168_v0  ;;  %v30_v1 = vld [vmem:[%s247_s1 + $0x78] sm:$0xff]  ;;  %v29_v2 = vld [vmem:[%s247_s1 + $0x70] sm:$0xff]  ;;  %163 = vmatprep.mubr.msk.f32.mxu0 %vm169_vm0, %v168_v0  ;;  %v28_v3 = vld [vmem:[%s247_s1 + $0x68] sm:$0xff] }
   0x2   :  { %132 = vmatpush3.msra.mxu0 %v30_v1  ;;  %v27_v4 = vld [vmem:[%s247_s1 + $0x60] sm:$0xff]  ;;  %v26_v5 = vld [vmem:[%s247_s1 + $0x58] sm:$0xff]  ;;  %v25_v6 = vld [vmem:[%s247_s1 + $0x50] sm:$0xff] }
   0x3   :  { %133 = vmatprep.subr.mxu0 %v168_v0  ;;  %v24_v7 = vld [vmem:[%s247_s1 + $0x48] sm:$0xff]  ;;  %v23_v8 = vld [vmem:[%s247_s1 + $0x40] sm:$0xff]  ;;  %v22_v9 = vld [vmem:[%s247_s1 + $0x38] sm:$0xff] }
   0x4   :  { %134 = vmatpush3.msra.mxu0 %v29_v2  ;;  %v21_v10 = vld [vmem:[%s247_s1 + $0x30] sm:$0xff]  ;;  %v20_v11 = vld [vmem:[%s247_s1 + $0x28] sm:$0xff]  ;;  %v19_v12 = vld [vmem:[%s247_s1 + $0x20] sm:$0xff] }
   0x5   :  { %135 = vmatprep.subr.mxu0 %v168_v0  ;;  %v18_v13 = vld [vmem:[%s247_s1 + $0x18] sm:$0xff]  ;;  %v17_v14 = vld [vmem:[%s247_s1 + $0x10] sm:$0xff]  ;;  %v16_v15 = vld [vmem:[%s247_s1 + $0x8] sm:$0xff] }
   0x6   :  { %136 = vmatpush3.msra.mxu0 %v28_v3  ;;  %v15_v16 = vld [vmem:[%s247_s1] sm:$0xff] }
   0x7   :  { %137 = vmatprep.subr.mxu0 %v168_v0  ;;  %v14_v17 = vld [vmem:[%s248_s0] sm:$0xff] }
   0x8   :  { %138 = vmatpush3.msra.mxu0 %v27_v4  ;;  %v113_v18 = vld [vmem:[%s249_s2] ss:$0 sm:$0xff] }
   0x9   :  { %139 = vmatprep.subr.mxu0 %v168_v0 }
   0xa   :  { %140 = vmatpush3.msra.mxu0 %v26_v5 }
   0xb   :  { %141 = vmatprep.subr.mxu0 %v168_v0 }
   0xc   :  { %142 = vmatpush3.msra.mxu0 %v25_v6 }
   0xd   :  { %143 = vmatprep.subr.mxu0 %v168_v0 }
   0xe   :  { %144 = vmatpush3.msra.mxu0 %v24_v7 }
   0xf   :  { %145 = vmatprep.subr.mxu0 %v168_v0 }
  0x10   :  { %146 = vmatpush3.msra.mxu0 %v23_v8 }
  0x11   :  { %147 = vmatprep.subr.mxu0 %v168_v0 }
  0x12   :  { %148 = vmatpush3.msra.mxu0 %v22_v9 }
  0x13   :  { %149 = vmatprep.subr.mxu0 %v168_v0 }
  0x14   :  { %150 = vmatpush3.msra.mxu0 %v21_v10 }
  0x15   :  { %151 = vmatprep.subr.mxu0 %v168_v0 }
  0x16   :  { %152 = vmatpush3.msra.mxu0 %v20_v11 }
  0x17   :  { %153 = vmatprep.subr.mxu0 %v168_v0 }
  0x18   :  { %154 = vmatpush3.msra.mxu0 %v19_v12 }
  0x19   :  { %155 = vmatprep.subr.mxu0 %v168_v0 }
  0x1a   :  { %156 = vmatpush3.msra.mxu0 %v18_v13 }
  0x1b   :  { %157 = vmatprep.subr.mxu0 %v168_v0 }
  0x1c   :  { %158 = vmatpush3.msra.mxu0 %v17_v14 }
  0x1d   :  { %159 = vmatprep.subr.mxu0 %v168_v0 }
  0x1e   :  { %160 = vmatpush3.msra.mxu0 %v16_v15 }
  0x1f   :  { %161 = vmatprep.subr.mxu0 %v168_v0 }
  0x20   :  { %162 = vmatpush3.msra.mxu0 %v15_v16 }
  0x21   :  { %164 = vmatmul.mubr.f32.vlgmr.msra.gmra.mxu0 %v14_v17 }
  0xe1   :  { %v104_v19 = vpop.f32.mrf.mxu0 }
  0xe2   :  { %v105_v20 = vadd.f32 %v113_v18, %v104_v19 }
  0xe3   :  { %v165_v21 = vpop.f32.mrf.mxu0 }
  0xe4   :  { %108 = vst [vmem:[%s250_s3] sm:$0xff] %v105_v20 }

</bundles_post_ra>
